<compile_context>
chip_gen: v7x
topology: tpu7x:2x2x1
jax: 0.10.0
libtpu: 0.0.40
codegen_flags: <defaults>
</compile_context>

<pallas_src>
import jax
import jax.numpy as jnp
from jax.experimental import pallas as pl
from jax.experimental.pallas import tpu as pltpu

IN_PAD = 128     # 44  -> 128
HID_PAD = 256    # 200 -> 256
OUT_PAD = 128    # 5   -> 128


def _round_up(n, m):
    return ((n + m - 1) // m) * m


def dnn_kernel(x_ref, w1_ref, b1_ref, w2_ref, b2_ref, w3_ref, b3_ref, o_ref):
    # fc1 + ReLU   (padded hidden columns stay exactly 0: relu(0 + 0) = 0)
    h = jnp.dot(x_ref[...], w1_ref[...], preferred_element_type=jnp.float32)
    h = jnp.maximum(h + b1_ref[...], 0.0)
    # fc2 + ReLU
    h = jnp.dot(h, w2_ref[...], preferred_element_type=jnp.float32)
    h = jnp.maximum(h + b2_ref[...], 0.0)
    # fc3 (no activation); lane-dense 128-wide store
    out = jnp.dot(h, w3_ref[...], preferred_element_type=jnp.float32)
    o_ref[...] = (out + b3_ref[...]).astype(o_ref.dtype)


def pad_params(p):
    """Zero-pad logical params to MXU/lane-friendly padded shapes."""
    def pad2(a, r, c):
        return jnp.pad(a, ((0, r - a.shape[0]), (0, c - a.shape[1])))
    return {
        "w1": pad2(p["w1"], IN_PAD, HID_PAD),
        "b1": pad2(p["b1"], 1, HID_PAD),
        "w2": pad2(p["w2"], HID_PAD, HID_PAD),
        "b2": pad2(p["b2"], 1, HID_PAD),
        "w3": pad2(p["w3"], HID_PAD, OUT_PAD),
        "b3": pad2(p["b3"], 1, OUT_PAD),
    }


def dnn_forward(x, padded_params, *, outputs=5, block_b=256):
    """x: (B, inputs<=128) float32. padded_params: output of pad_params()."""
    B, f_in = x.shape
    pp = padded_params

    # Batch tile: multiple of 8, capped at block_b; pad batch to a multiple.
    TB = min(block_b, max(8, _round_up(B, 8)))
    Bp = _round_up(B, TB)
    xp = jnp.pad(x, ((0, Bp - B), (0, IN_PAD - f_in)))

    grid = (pl.cdiv(Bp, TB),)

    flops = 2 * Bp * (IN_PAD * HID_PAD + HID_PAD * HID_PAD + HID_PAD * OUT_PAD)
    bytes_accessed = 4 * (
        xp.size + sum(int(a.size) for a in pp.values()) + Bp * OUT_PAD)

    out = pl.pallas_call(
        dnn_kernel,
        out_shape=jax.ShapeDtypeStruct((Bp, OUT_PAD), jnp.float32),
        grid=grid,
        in_specs=[
            pl.BlockSpec((TB, IN_PAD), lambda i: (i, 0)),        # x tile
            pl.BlockSpec((IN_PAD, HID_PAD), lambda i: (0, 0)),   # w1 (resident)
            pl.BlockSpec((1, HID_PAD), lambda i: (0, 0)),        # b1
            pl.BlockSpec((HID_PAD, HID_PAD), lambda i: (0, 0)),  # w2
            pl.BlockSpec((1, HID_PAD), lambda i: (0, 0)),        # b2
            pl.BlockSpec((HID_PAD, OUT_PAD), lambda i: (0, 0)),  # w3
            pl.BlockSpec((1, OUT_PAD), lambda i: (0, 0)),        # b3
        ],
        out_specs=pl.BlockSpec((TB, OUT_PAD), lambda i: (i, 0)),
        compiler_params=pltpu.CompilerParams(
            dimension_semantics=("parallel",)),
        cost_estimate=pl.CostEstimate(
            flops=flops, transcendentals=0, bytes_accessed=bytes_accessed),
    )(xp, pp["w1"], pp["b1"], pp["w2"], pp["b2"], pp["w3"], pp["b3"])

    return out[:B, :outputs]


def init_params(key, inputs=44, nfc=200, outputs=5):
    """Deterministic init mirroring nn.Linear's uniform(-1/sqrt(fan_in), +)."""
    ks = jax.random.split(key, 6)

    def linear(kw, kb, fan_in, fan_out):
        bound = 1.0 / jnp.sqrt(jnp.float32(fan_in))
        w = jax.random.uniform(kw, (fan_in, fan_out), jnp.float32, -bound, bound)
        b = jax.random.uniform(kb, (1, fan_out), jnp.float32, -bound, bound)
        return w, b

    w1, b1 = linear(ks[0], ks[1], inputs, nfc)
    w2, b2 = linear(ks[2], ks[3], nfc, nfc)
    w3, b3 = linear(ks[4], ks[5], nfc, outputs)
    return {"w1": w1, "b1": b1, "w2": w2, "b2": b2, "w3": w3, "b3": b3}


def reference_forward(x, p):
    h = jnp.maximum(x @ p["w1"] + p["b1"], 0.0)
    h = jnp.maximum(h @ p["w2"] + p["b2"], 0.0)
    return h @ p["w3"] + p["b3"]


if __name__ == "__main__":
    key = jax.random.PRNGKey(0)
    k_params, k_x1, k_x2 = jax.random.split(key, 3)

    inputs, outputs = 44, 5
    params = init_params(k_params, inputs=inputs, outputs=outputs)
    padded = pad_params(params)

    # Small batch (spec-consistent): batch=2 -> single 8-row tile.
    x_small = jax.random.normal(k_x1, (2, inputs), dtype=jnp.float32)
    out_small = jax.block_until_ready(dnn_forward(x_small, padded, outputs=outputs))
    ref_small = reference_forward(x_small, params)
    assert out_small.shape == (2, outputs)
    assert jnp.allclose(out_small, ref_small, atol=1e-4, rtol=1e-4), \
        "small-batch mismatch vs pure-JAX reference"

    # Larger batch to exercise the batch-tiled grid (TB=256, grid=(2,)) + padding.
    x_big = jax.random.normal(k_x2, (300, inputs), dtype=jnp.float32)
    out_big = jax.block_until_ready(dnn_forward(x_big, padded, outputs=outputs))
    ref_big = reference_forward(x_big, params)
    assert out_big.shape == (300, outputs)
    assert jnp.allclose(out_big, ref_big, atol=1e-4, rtol=1e-4), \
        "large-batch mismatch vs pure-JAX reference"

    print("KERNEL_OK")
</pallas_src>

<mosaic_0001>
module attributes {stable_mosaic.version = 11 : i64} {
  func.func @dnn_kernel(%arg0: i32, %arg1: memref<8x128xf32, #tpu.memory_space<vmem>>, %arg2: memref<128x256xf32, #tpu.memory_space<vmem>>, %arg3: memref<1x256xf32, #tpu.memory_space<vmem>>, %arg4: memref<256x256xf32, #tpu.memory_space<vmem>>, %arg5: memref<1x256xf32, #tpu.memory_space<vmem>>, %arg6: memref<256x128xf32, #tpu.memory_space<vmem>>, %arg7: memref<1x128xf32, #tpu.memory_space<vmem>>, %arg8: memref<8x128xf32, #tpu.memory_space<vmem>>) attributes {dimension_semantics = [#tpu.dimension_semantics<parallel>], iteration_bounds = array<i64: 1>, scalar_prefetch = 0 : i64, scratch_operands = 0 : i64, tpu.core_type = #tpu.core_type<tc>, window_params = [{transform_indices = @transform_0, window_bounds = array<i64: 8, 128>}, {pipeline_mode = #tpu.pipeline_mode<synchronous>, transform_indices = @transform_1, window_bounds = array<i64: 128, 256>}, {pipeline_mode = #tpu.pipeline_mode<synchronous>, transform_indices = @transform_2, window_bounds = array<i64: 1, 256>}, {pipeline_mode = #tpu.pipeline_mode<synchronous>, transform_indices = @transform_3, window_bounds = array<i64: 256, 256>}, {pipeline_mode = #tpu.pipeline_mode<synchronous>, transform_indices = @transform_4, window_bounds = array<i64: 1, 256>}, {pipeline_mode = #tpu.pipeline_mode<synchronous>, transform_indices = @transform_5, window_bounds = array<i64: 256, 128>}, {pipeline_mode = #tpu.pipeline_mode<synchronous>, transform_indices = @transform_6, window_bounds = array<i64: 1, 128>}, {transform_indices = @transform_7, window_bounds = array<i64: 8, 128>}]} {
    %c0 = arith.constant 0 : index
    %c0_0 = arith.constant 0 : index
    %0 = vector.load %arg1[%c0, %c0_0] : memref<8x128xf32, #tpu.memory_space<vmem>>, vector<8x128xf32>
    %c0_1 = arith.constant 0 : index
    %c0_2 = arith.constant 0 : index
    %1 = vector.load %arg2[%c0_1, %c0_2] : memref<128x256xf32, #tpu.memory_space<vmem>>, vector<128x256xf32>
    %cst = arith.constant dense<0.000000e+00> : vector<8x256xf32>
    %2 = tpu.matmul %0, %1, %cst {dimension_numbers = #tpu.dot_dimension_numbers<[1], [0], [0], [1], [0, 0, 1, 1], [], []>} : vector<8x128xf32>, vector<128x256xf32>, vector<8x256xf32> -> vector<8x256xf32>
    %c0_3 = arith.constant 0 : index
    %c0_4 = arith.constant 0 : index
    %3 = vector.load %arg3[%c0_3, %c0_4] : memref<1x256xf32, #tpu.memory_space<vmem>>, vector<1x256xf32>
    %4 = vector.broadcast %3 : vector<1x256xf32> to vector<8x256xf32>
    %5 = arith.addf %2, %4 : vector<8x256xf32>
    %cst_5 = arith.constant 0.000000e+00 : f32
    %6 = vector.broadcast %cst_5 : f32 to vector<8x256xf32>
    %7 = arith.maximumf %5, %6 : vector<8x256xf32>
    %c0_6 = arith.constant 0 : index
    %c0_7 = arith.constant 0 : index
    %8 = vector.load %arg4[%c0_6, %c0_7] : memref<256x256xf32, #tpu.memory_space<vmem>>, vector<256x256xf32>
    %cst_8 = arith.constant dense<0.000000e+00> : vector<8x256xf32>
    %9 = tpu.matmul %7, %8, %cst_8 {dimension_numbers = #tpu.dot_dimension_numbers<[1], [0], [0], [1], [0, 0, 1, 1], [], []>} : vector<8x256xf32>, vector<256x256xf32>, vector<8x256xf32> -> vector<8x256xf32>
    %c0_9 = arith.constant 0 : index
    %c0_10 = arith.constant 0 : index
    %10 = vector.load %arg5[%c0_9, %c0_10] : memref<1x256xf32, #tpu.memory_space<vmem>>, vector<1x256xf32>
    %11 = vector.broadcast %10 : vector<1x256xf32> to vector<8x256xf32>
    %12 = arith.addf %9, %11 : vector<8x256xf32>
    %cst_11 = arith.constant 0.000000e+00 : f32
    %13 = vector.broadcast %cst_11 : f32 to vector<8x256xf32>
    %14 = arith.maximumf %12, %13 : vector<8x256xf32>
    %c0_12 = arith.constant 0 : index
    %c0_13 = arith.constant 0 : index
    %15 = vector.load %arg6[%c0_12, %c0_13] : memref<256x128xf32, #tpu.memory_space<vmem>>, vector<256x128xf32>
    %cst_14 = arith.constant dense<0.000000e+00> : vector<8x128xf32>
    %16 = tpu.matmul %14, %15, %cst_14 {dimension_numbers = #tpu.dot_dimension_numbers<[1], [0], [0], [1], [0, 0, 1, 1], [], []>} : vector<8x256xf32>, vector<256x128xf32>, vector<8x128xf32> -> vector<8x128xf32>
    %c0_15 = arith.constant 0 : index
    %c0_16 = arith.constant 0 : index
    %17 = vector.load %arg7[%c0_15, %c0_16] : memref<1x128xf32, #tpu.memory_space<vmem>>, vector<1x128xf32>
    %18 = vector.broadcast %17 : vector<1x128xf32> to vector<8x128xf32>
    %19 = arith.addf %16, %18 : vector<8x128xf32>
    %c0_17 = arith.constant 0 : index
    %c0_18 = arith.constant 0 : index
    %20 = vector.load %arg8[%c0_17, %c0_18] : memref<8x128xf32, #tpu.memory_space<vmem>>, vector<8x128xf32>
    tpu.vector_store %arg8[%c0_17, %c0_18], %19 {strides = array<i32>} : memref<8x128xf32, #tpu.memory_space<vmem>>, vector<8x128xf32>,
    return
  }
  func.func @transform_0(%arg0: i32) -> (i32, i32) {
    %c0_i32 = arith.constant 0 : i32
    %c0_i32_0 = arith.constant 0 : i32
    return %arg0, %c0_i32 : i32, i32
  }
  func.func @transform_1(%arg0: i32) -> (i32, i32) {
    %c0_i32 = arith.constant 0 : i32
    %c0_i32_0 = arith.constant 0 : i32
    %c0_i32_1 = arith.constant 0 : i32
    return %c0_i32, %c0_i32_0 : i32, i32
  }
  func.func @transform_2(%arg0: i32) -> (i32, i32) {
    %c0_i32 = arith.constant 0 : i32
    %c0_i32_0 = arith.constant 0 : i32
    %c0_i32_1 = arith.constant 0 : i32
    return %c0_i32, %c0_i32_0 : i32, i32
  }
  func.func @transform_3(%arg0: i32) -> (i32, i32) {
    %c0_i32 = arith.constant 0 : i32
    %c0_i32_0 = arith.constant 0 : i32
    %c0_i32_1 = arith.constant 0 : i32
    return %c0_i32, %c0_i32_0 : i32, i32
  }
  func.func @transform_4(%arg0: i32) -> (i32, i32) {
    %c0_i32 = arith.constant 0 : i32
    %c0_i32_0 = arith.constant 0 : i32
    %c0_i32_1 = arith.constant 0 : i32
    return %c0_i32, %c0_i32_0 : i32, i32
  }
  func.func @transform_5(%arg0: i32) -> (i32, i32) {
    %c0_i32 = arith.constant 0 : i32
    %c0_i32_0 = arith.constant 0 : i32
    %c0_i32_1 = arith.constant 0 : i32
    return %c0_i32, %c0_i32_0 : i32, i32
  }
  func.func @transform_6(%arg0: i32) -> (i32, i32) {
    %c0_i32 = arith.constant 0 : i32
    %c0_i32_0 = arith.constant 0 : i32
    %c0_i32_1 = arith.constant 0 : i32
    return %c0_i32, %c0_i32_0 : i32, i32
  }
  func.func @transform_7(%arg0: i32) -> (i32, i32) {
    %c0_i32 = arith.constant 0 : i32
    %c0_i32_0 = arith.constant 0 : i32
    return %arg0, %c0_i32 : i32, i32
  }
}

</mosaic_0001>

<bundles_post_ra>
// kernel: tpu_custom_call.1
= control target key start
LH: loop header
LB: loop body
LE: loop exit
PB: predicated region body
PF: predicated region fallthrough
CT: control target
= control target key end

     0   :  { %12 = vsyncpa [#allocation3], 0  ;;  %s891_s0 = inlined_call_operand.hbm [shape: f32[8,128], index: 0, kind: input, shape index: {}]   ;;  %s892_s1 = inlined_call_operand.hbm [shape: f32[128,256], index: 1, kind: input, shape index: {}]   ;;  %s893_s2 = inlined_call_operand.vmem [shape: f32[1,256], index: 2, kind: input, shape index: {}]   ;;  %s894_s3 = inlined_call_operand.hbm [shape: f32[256,256], index: 3, kind: input, shape index: {}]   ;;  %s895_s4 = inlined_call_operand.vmem [shape: f32[1,256], index: 4, kind: input, shape index: {}]   ;;  %s896_s5 = inlined_call_operand.hbm [shape: f32[256,128], index: 5, kind: input, shape index: {}]   ;;  %s897_s6 = inlined_call_operand.vmem [shape: f32[1,128], index: 6, kind: input, shape index: {}]   ;;  %s898_s7 = inlined_call_operand.hbm [shape: f32[8,128], index: 7, kind: output, shape index: {}]  }
   0x1   :  { %13 = vsyncpa [#allocation6], 0 }
   0x2   :  { %14 = vsyncpa [#allocation9], 0 }
   0x3   :  { %15 = vsyncpa [#allocation4], 0  ;;  %s766_s24 = smov [#allocation5]   ;;  %s648_s28 = scalar_lea.hbm %s892_s1, 4096 }
   0x4   :  { %s31_s25 = sshll.u32 %s766_s24, 4  ;;  %p649_p0 = scmp.ne.s32.totalorder %s892_s1, %s648_s28  ;;  %s32_s25 = int_to_ptr.vmem [resolvable:$true] %s31_s25 }
   0x5   :  { %p652_p1 = scmp.lt.u32.totalorder %s648_s28, %s892_s1 }
   0x7   :  { %p654_p2 = pnand %p652_p1, %p649_p0 }
   0x9   :  { %657 = shalt.err (!%p654_p2)
}
   0xa   :  { %s658_s10 = scalar_lea.vmem %s32_s25, 4096  ;;  %p663_p4 = scmp.lt.s32.totalorder %s32_s25, %s32_s25 }
   0xb   :  { %p659_p3 = scmp.ne.s32.totalorder %s32_s25, %s658_s10  ;;  %p664_p5 = scmp.lt.s32.totalorder %s658_s10, %s658_s10 }
   0xd   :  { %p665_p6 = por %p664_p5, %p663_p4 }
   0xf   :  { %p666_p7 = pnand %p665_p6, %p659_p3 }
  0x11   :  { %669 = shalt.err (!%p666_p7)
}
  0x12   :  { %s767_s11 = smov 256   ;;  %s768_s12 = smov 16  }
  0x13   :  { %37 = dma.hbm_to_vmem [thread:$0]  %s892_s1, 4096, %s32_s25, [#allocation6], %s767_s11, %s767_s11, %s768_s12  }
  0x14   :  { %s769_s15 = smov [#allocation2]   ;;  %s770_s17 = smov [#allocation7]  }
  0x15   :  { %s22_s16 = sshll.u32 %s769_s15, 4  ;;  %s45_s18 = sshll.u32 %s770_s17, 4  ;;  %s23_s16 = int_to_ptr.vmem [resolvable:$true] %s22_s16  ;;  %s46_s18 = int_to_ptr.vmem [resolvable:$true] %s45_s18 }
  0x16   :  { %s670_s21 = scalar_lea.hbm %s891_s0, 128 }
  0x17   :  { %p671_p8 = scmp.ne.s32.totalorder %s891_s0, %s670_s21  ;;  %p674_p9 = scmp.lt.u32.totalorder %s670_s21, %s891_s0 }
  0x19   :  { %p676_p10 = pnand %p674_p9, %p671_p8 }
  0x1b   :  { %679 = shalt.err (!%p676_p10)
}
  0x1c   :  { %s680_s1 = scalar_lea.vmem %s23_s16, 128  ;;  %p685_p12 = scmp.lt.s32.totalorder %s23_s16, %s23_s16 }
  0x1d   :  { %p681_p11 = scmp.ne.s32.totalorder %s23_s16, %s680_s1  ;;  %p686_p13 = scmp.lt.s32.totalorder %s680_s1, %s680_s1 }
  0x1f   :  { %p687_p0 = por %p686_p13, %p685_p12 }
  0x21   :  { %p688_p1 = pnand %p687_p0, %p681_p11 }
  0x23   :  { %691 = shalt.err (!%p688_p1)
}
  0x24   :  { %25 = dma.hbm_to_vmem [thread:$0]  %s891_s0, 128, %s23_s16, [#allocation3]  }
  0x25   :  { %s692_s30 = scalar_lea.hbm %s894_s3, 8192 }
  0x26   :  { %p693_p2 = scmp.ne.s32.totalorder %s894_s3, %s692_s30  ;;  %p696_p3 = scmp.lt.u32.totalorder %s692_s30, %s894_s3 }
  0x28   :  { %p698_p4 = pnand %p696_p3, %p693_p2 }
  0x2a   :  { %701 = shalt.err (!%p698_p4)
}
  0x2b   :  { %s702_s14 = scalar_lea.vmem %s46_s18, 8192  ;;  %p707_p6 = scmp.lt.s32.totalorder %s46_s18, %s46_s18 }
  0x2c   :  { %p703_p5 = scmp.ne.s32.totalorder %s46_s18, %s702_s14  ;;  %p708_p7 = scmp.lt.s32.totalorder %s702_s14, %s702_s14 }
  0x2e   :  { %p709_p8 = por %p708_p7, %p707_p6 }
  0x30   :  { %p710_p9 = pnand %p709_p8, %p703_p5 }
  0x32   :  { %713 = shalt.err (!%p710_p9)
}
  0x33   :  { %51 = dma.hbm_to_vmem [thread:$0]  %s894_s3, 8192, %s46_s18, [#allocation6], %s767_s11, %s767_s11, %s768_s12  }
  0x34   :  { %s771_s16 = smov [#allocation8]   ;;  %s714_s21 = scalar_lea.hbm %s896_s5, 4096 }
  0x35   :  { %s59_s17 = sshll.u32 %s771_s16, 4  ;;  %p715_p10 = scmp.ne.s32.totalorder %s896_s5, %s714_s21  ;;  %s60_s17 = int_to_ptr.vmem [resolvable:$true] %s59_s17 }
  0x36   :  { %p718_p11 = scmp.lt.u32.totalorder %s714_s21, %s896_s5 }
  0x38   :  { %p720_p12 = pnand %p718_p11, %p715_p10 }
  0x3a   :  { %723 = shalt.err (!%p720_p12)
}
  0x3b   :  { %s724_s1 = scalar_lea.vmem %s60_s17, 4096  ;;  %p729_p0 = scmp.lt.s32.totalorder %s60_s17, %s60_s17 }
  0x3c   :  { %p725_p13 = scmp.ne.s32.totalorder %s60_s17, %s724_s1  ;;  %p730_p1 = scmp.lt.s32.totalorder %s724_s1, %s724_s1 }
  0x3e   :  { %p731_p2 = por %p730_p1, %p729_p0 }
  0x40   :  { %p732_p3 = pnand %p731_p2, %p725_p13 }
  0x42   :  { %735 = shalt.err (!%p732_p3)
}
  0x43   :  { %s772_s3 = smov 128   ;;  %s773_s11 = smov 8  }
  0x44   :  { %65 = dma.hbm_to_vmem [thread:$0]  %s896_s5, 4096, %s60_s17, [#allocation9], %s772_s3, %s772_s3, %s773_s11  }
  0x45   :  { %758 = dma.done.wait [#allocation3], 128  }
  0x46   :  { %759 = vsyncadd [#allocation3], 4294967168 }
  0x47   :  { %760 = dma.done.wait [#allocation6], 12288  }
  0x48   :  { %761 = vsyncadd [#allocation6], 4294955008 }
  0x49   :  { %762 = dma.done.wait [#allocation9], 4096  }
  0x4a   :  { %763 = vsyncadd [#allocation9], 4294963200  ;;  %v774_v0 = vmov 0.0   ;;  %v82_v1 = vld [vmem:[#allocation5 + $0x8] sm:$0xff]  ;;  %v84_v2 = vld [vmem:[#allocation5 + $0x18] sm:$0xff]  ;;  %s775_s30 = smov [#allocation10]  }
  0x4b   :  { %189 = vmatprep.mubr.f32.mxu0 %v774_v0  ;;  %v81_v3 = vld [vmem:[#allocation5] sm:$0xff]  ;;  %v510_v4 = vpack.c.bf16 %v84_v2, %v82_v1  ;;  %v83_v5 = vld [vmem:[#allocation5 + $0x10] sm:$0xff]  ;;  %v86_v6 = vld [vmem:[#allocation5 + $0x28] sm:$0xff]  ;;  %s463_s8 = sshll.u32 %s775_s30, 4  ;;  %s464_s8 = int_to_ptr.vmem [resolvable:$true] %s463_s8 }
  0x4c   :  { %v88_v7 = vld [vmem:[#allocation5 + $0x38] sm:$0xff]  ;;  %v512_v8 = vpack.c.bf16 %v83_v5, %v81_v3  ;;  %v85_v10 = vld [vmem:[#allocation5 + $0x20] sm:$0xff]  ;;  %v87_v11 = vld [vmem:[#allocation5 + $0x30] sm:$0xff]  ;;  %p741_p5 = scmp.lt.s32.totalorder %s464_s8, %s464_s8 }
  0x4d   :  { %v514_v9 = vpack.c.bf16 %v88_v7, %v86_v6  ;;  %v90_v12 = vld [vmem:[#allocation5 + $0x48] sm:$0xff]  ;;  %511 = vmatprep.subr.bf16.mxu0 %v510_v4  ;;  %v92_v13 = vld [vmem:[#allocation5 + $0x58] sm:$0xff]  ;;  %v516_v14 = vpack.c.bf16 %v87_v11, %v85_v10  ;;  %v89_v16 = vld [vmem:[#allocation5 + $0x40] sm:$0xff] }
  0x4e   :  { %513 = vmatpush1.bf16.msra.mxu0 %v512_v8  ;;  %v518_v15 = vpack.c.bf16 %v92_v13, %v90_v12  ;;  %v91_v17 = vld [vmem:[#allocation5 + $0x50] sm:$0xff]  ;;  %v94_v18 = vld [vmem:[#allocation5 + $0x68] sm:$0xff]  ;;  %v96_v19 = vld [vmem:[#allocation5 + $0x78] sm:$0xff] }
  0x4f   :  { %515 = vmatprep.subr.bf16.mxu0 %v514_v9  ;;  %v520_v20 = vpack.c.bf16 %v91_v17, %v89_v16  ;;  %v522_v21 = vpack.c.bf16 %v96_v19, %v94_v18  ;;  %v93_v22 = vld [vmem:[#allocation5 + $0x60] sm:$0xff]  ;;  %v95_v23 = vld [vmem:[#allocation5 + $0x70] sm:$0xff]  ;;  %v98_v24 = vld [vmem:[#allocation5 + $0x88] sm:$0xff] }
  0x50   :  { %v100_v25 = vld [vmem:[#allocation5 + $0x98] sm:$0xff]  ;;  %v97_v26 = vld [vmem:[#allocation5 + $0x80] sm:$0xff]  ;;  %v99_v27 = vld [vmem:[#allocation5 + $0x90] sm:$0xff]  ;;  %v524_v31 = vpack.c.bf16 %v95_v23, %v93_v22 }
  0x51   :  { %v199_v28 = vld [vmem:[#allocation7 + $0x8] sm:$0xff]  ;;  %v201_v29 = vld [vmem:[#allocation7 + $0x18] sm:$0xff]  ;;  %v198_v30 = vld [vmem:[#allocation7] sm:$0xff]  ;;  %v526_v36 = vpack.c.bf16 %v100_v25, %v98_v24  ;;  %v528_v46 = vpack.c.bf16 %v99_v27, %v97_v26 }
  0x52   :  { %517 = vmatpush1.bf16.msra.mxu0 %v516_v14  ;;  %v542_v32 = vpack.c.bf16 %v201_v29, %v199_v28  ;;  %v200_v33 = vld [vmem:[#allocation7 + $0x10] sm:$0xff]  ;;  %v203_v34 = vld [vmem:[#allocation7 + $0x28] sm:$0xff]  ;;  %v205_v35 = vld [vmem:[#allocation7 + $0x38] sm:$0xff] }
  0x53   :  { %519 = vmatprep.subr.bf16.mxu0 %v518_v15  ;;  %v544_v37 = vpack.c.bf16 %v200_v33, %v198_v30  ;;  %v546_v38 = vpack.c.bf16 %v205_v35, %v203_v34  ;;  %v202_v39 = vld [vmem:[#allocation7 + $0x20] sm:$0xff]  ;;  %v204_v40 = vld [vmem:[#allocation7 + $0x30] sm:$0xff]  ;;  %v207_v41 = vld [vmem:[#allocation7 + $0x48] sm:$0xff] }
  0x54   :  { %v102_v42 = vld [vmem:[#allocation5 + $0xa8] sm:$0xff]  ;;  %v104_v43 = vld [vmem:[#allocation5 + $0xb8] sm:$0xff]  ;;  %543 = vmatprep.subr.bf16.mxu1 %v542_v32  ;;  %v548_v45 = vpack.c.bf16 %v204_v40, %v202_v39  ;;  %v101_v47 = vld [vmem:[#allocation5 + $0xa0] sm:$0xff] }
  0x55   :  { %v209_v44 = vld [vmem:[#allocation7 + $0x58] sm:$0xff]  ;;  %545 = vmatpush1.bf16.msra.mxu1 %v544_v37  ;;  %v206_v49 = vld [vmem:[#allocation7 + $0x40] sm:$0xff]  ;;  %v208_v50 = vld [vmem:[#allocation7 + $0x50] sm:$0xff]  ;;  %v530_v51 = vpack.c.bf16 %v104_v43, %v102_v42 }
  0x56   :  { %521 = vmatpush1.bf16.msra.mxu0 %v520_v20  ;;  %547 = vmatprep.subr.bf16.mxu1 %v546_v38  ;;  %v550_v48 = vpack.c.bf16 %v209_v44, %v207_v41  ;;  %v103_v52 = vld [vmem:[#allocation5 + $0xb0] sm:$0xff]  ;;  %v211_v53 = vld [vmem:[#allocation7 + $0x68] sm:$0xff]  ;;  %v213_v54 = vld [vmem:[#allocation7 + $0x78] sm:$0xff]  ;;  %v552_v57 = vpack.c.bf16 %v208_v50, %v206_v49 }
  0x57   :  { %523 = vmatprep.subr.bf16.mxu0 %v522_v21  ;;  %v106_v55 = vld [vmem:[#allocation5 + $0xc8] sm:$0xff]  ;;  %v108_v56 = vld [vmem:[#allocation5 + $0xd8] sm:$0xff]  ;;  %v532_v58 = vpack.c.bf16 %v103_v52, %v101_v47  ;;  %v105_v59 = vld [vmem:[#allocation5 + $0xc0] sm:$0xff]  ;;  %v554_v60 = vpack.c.bf16 %v213_v54, %v211_v53 }
  0x58   :  { %v210_v61 = vld [vmem:[#allocation7 + $0x60] sm:$0xff]  ;;  %v212_v62 = vld [vmem:[#allocation7 + $0x70] sm:$0xff]  ;;  %v534_v63 = vpack.c.bf16 %v108_v56, %v106_v55  ;;  %v215_v1 = vld [vmem:[#allocation7 + $0x88] sm:$0xff] }
  0x59   :  { %549 = vmatpush1.bf16.msra.mxu1 %v548_v45  ;;  %v107_v0 = vld [vmem:[#allocation5 + $0xd0] sm:$0xff]  ;;  %v217_v2 = vld [vmem:[#allocation7 + $0x98] sm:$0xff]  ;;  %v110_v3 = vld [vmem:[#allocation5 + $0xe8] sm:$0xff]  ;;  %v556_v5 = vpack.c.bf16 %v212_v62, %v210_v61 }
  0x5a   :  { %525 = vmatpush1.bf16.msra.mxu0 %v524_v31  ;;  %551 = vmatprep.subr.bf16.mxu1 %v550_v48  ;;  %v112_v4 = vld [vmem:[#allocation5 + $0xf8] sm:$0xff]  ;;  %v536_v6 = vpack.c.bf16 %v107_v0, %v105_v59  ;;  %v109_v7 = vld [vmem:[#allocation5 + $0xe0] sm:$0xff]  ;;  %v558_v8 = vpack.c.bf16 %v217_v2, %v215_v1  ;;  %v216_v10 = vld [vmem:[#allocation7 + $0x90] sm:$0xff] }
  0x5b   :  { %527 = vmatprep.subr.bf16.mxu0 %v526_v36  ;;  %v214_v9 = vld [vmem:[#allocation7 + $0x80] sm:$0xff]  ;;  %v538_v11 = vpack.c.bf16 %v112_v4, %v110_v3  ;;  %v111_v12 = vld [vmem:[#allocation5 + $0xf0] sm:$0xff]  ;;  %v219_v13 = vld [vmem:[#allocation7 + $0xa8] sm:$0xff] }
  0x5c   :  { %v221_v14 = vld [vmem:[#allocation7 + $0xb8] sm:$0xff]  ;;  %v560_v15 = vpack.c.bf16 %v216_v10, %v214_v9  ;;  %v540_v16 = vpack.c.bf16 %v111_v12, %v109_v7  ;;  %v218_v18 = vld [vmem:[#allocation7 + $0xa0] sm:$0xff]  ;;  %v220_v19 = vld [vmem:[#allocation7 + $0xb0] sm:$0xff] }
  0x5d   :  { %553 = vmatpush1.bf16.msra.mxu1 %v552_v57  ;;  %v562_v17 = vpack.c.bf16 %v221_v14, %v219_v13  ;;  %v223_v20 = vld [vmem:[#allocation7 + $0xc8] sm:$0xff]  ;;  %v225_v21 = vld [vmem:[#allocation7 + $0xd8] sm:$0xff]  ;;  %v564_v22 = vpack.c.bf16 %v220_v19, %v218_v18  ;;  %v222_v25 = vld [vmem:[#allocation7 + $0xc0] sm:$0xff] }
  0x5e   :  { %529 = vmatpush1.bf16.msra.mxu0 %v528_v46  ;;  %555 = vmatprep.subr.bf16.mxu1 %v554_v60  ;;  %v80_v23 = vld [vmem:[#allocation2] sm:$0xff]  ;;  %v566_v24 = vpack.c.bf16 %v225_v21, %v223_v20  ;;  %v224_v26 = vld [vmem:[#allocation7 + $0xd0] sm:$0xff]  ;;  %v227_v27 = vld [vmem:[#allocation7 + $0xe8] sm:$0xff] }
  0x5f   :  { %531 = vmatprep.subr.bf16.mxu0 %v530_v51  ;;  %v229_v28 = vld [vmem:[#allocation7 + $0xf8] sm:$0xff]  ;;  %v568_v29 = vpack.c.bf16 %v224_v26, %v222_v25  ;;  %v226_v31 = vld [vmem:[#allocation7 + $0xe0] sm:$0xff]  ;;  %v228_v32 = vld [vmem:[#allocation7 + $0xf0] sm:$0xff] }
  0x60   :  { %v570_v30 = vpack.c.bf16 %v229_v28, %v227_v27  ;;  %v231_v33 = vld [vmem:[#allocation7 + $0x108] sm:$0xff]  ;;  %v233_v34 = vld [vmem:[#allocation7 + $0x118] sm:$0xff]  ;;  %v572_v35 = vpack.c.bf16 %v228_v32, %v226_v31  ;;  %v230_v37 = vld [vmem:[#allocation7 + $0x100] sm:$0xff] }
  0x61   :  { %557 = vmatpush1.bf16.msra.mxu1 %v556_v5  ;;  %v574_v36 = vpack.c.bf16 %v233_v34, %v231_v33  ;;  %v232_v38 = vld [vmem:[#allocation7 + $0x110] sm:$0xff]  ;;  %v235_v39 = vld [vmem:[#allocation7 + $0x128] sm:$0xff]  ;;  %v237_v40 = vld [vmem:[#allocation7 + $0x138] sm:$0xff] }
  0x62   :  { %533 = vmatpush1.bf16.msra.mxu0 %v532_v58  ;;  %559 = vmatprep.subr.bf16.mxu1 %v558_v8  ;;  %v576_v41 = vpack.c.bf16 %v232_v38, %v230_v37  ;;  %v578_v42 = vpack.c.bf16 %v237_v40, %v235_v39  ;;  %v234_v43 = vld [vmem:[#allocation7 + $0x120] sm:$0xff]  ;;  %v236_v44 = vld [vmem:[#allocation7 + $0x130] sm:$0xff]  ;;  %v239_v45 = vld [vmem:[#allocation7 + $0x148] sm:$0xff] }
  0x63   :  { %535 = vmatprep.subr.bf16.mxu0 %v534_v63  ;;  %v241_v46 = vld [vmem:[#allocation7 + $0x158] sm:$0xff]  ;;  %v580_v47 = vpack.c.bf16 %v236_v44, %v234_v43  ;;  %v238_v49 = vld [vmem:[#allocation7 + $0x140] sm:$0xff]  ;;  %v240_v50 = vld [vmem:[#allocation7 + $0x150] sm:$0xff] }
  0x64   :  { %v582_v48 = vpack.c.bf16 %v241_v46, %v239_v45  ;;  %v243_v51 = vld [vmem:[#allocation7 + $0x168] sm:$0xff]  ;;  %v245_v52 = vld [vmem:[#allocation7 + $0x178] sm:$0xff]  ;;  %v584_v53 = vpack.c.bf16 %v240_v50, %v238_v49  ;;  %v242_v55 = vld [vmem:[#allocation7 + $0x160] sm:$0xff] }
  0x65   :  { %561 = vmatpush1.bf16.msra.mxu1 %v560_v15  ;;  %v586_v54 = vpack.c.bf16 %v245_v52, %v243_v51  ;;  %v244_v56 = vld [vmem:[#allocation7 + $0x170] sm:$0xff]  ;;  %v247_v57 = vld [vmem:[#allocation7 + $0x188] sm:$0xff]  ;;  %v249_v58 = vld [vmem:[#allocation7 + $0x198] sm:$0xff] }
  0x66   :  { %537 = vmatpush1.bf16.msra.mxu0 %v536_v6  ;;  %563 = vmatprep.subr.bf16.mxu1 %v562_v17  ;;  %v588_v59 = vpack.c.bf16 %v244_v56, %v242_v55  ;;  %v590_v60 = vpack.c.bf16 %v249_v58, %v247_v57  ;;  %v246_v61 = vld [vmem:[#allocation7 + $0x180] sm:$0xff]  ;;  %v248_v62 = vld [vmem:[#allocation7 + $0x190] sm:$0xff]  ;;  %v251_v63 = vld [vmem:[#allocation7 + $0x1a8] sm:$0xff]  ;;  %v115_v57 = vlaneseq }
  0x67   :  { %539 = vmatprep.subr.bf16.mxu0 %v538_v11  ;;  %v253_v0 = vld [vmem:[#allocation7 + $0x1b8] sm:$0xff]  ;;  %v592_v1 = vpack.c.bf16 %v248_v62, %v246_v61  ;;  %v250_v3 = vld [vmem:[#allocation7 + $0x1a0] sm:$0xff]  ;;  %v252_v4 = vld [vmem:[#allocation7 + $0x1b0] sm:$0xff] }
  0x68   :  { %v594_v2 = vpack.c.bf16 %v253_v0, %v251_v63  ;;  %v255_v5 = vld [vmem:[#allocation7 + $0x1c8] sm:$0xff]  ;;  %v257_v6 = vld [vmem:[#allocation7 + $0x1d8] sm:$0xff]  ;;  %v596_v7 = vpack.c.bf16 %v252_v4, %v250_v3  ;;  %v254_v9 = vld [vmem:[#allocation7 + $0x1c0] sm:$0xff]  ;;  %v116_v58 = vshrl.u32 %v115_v57, 7 }
  0x69   :  { %565 = vmatpush1.bf16.msra.mxu1 %v564_v22  ;;  %v598_v8 = vpack.c.bf16 %v257_v6, %v255_v5  ;;  %v256_v10 = vld [vmem:[#allocation7 + $0x1d0] sm:$0xff]  ;;  %v259_v12 = vld [vmem:[#allocation7 + $0x1e8] sm:$0xff]  ;;  %v261_v13 = vld [vmem:[#allocation7 + $0x1f8] sm:$0xff] }
  0x6a   :  { %541 = vmatpush1.bf16.msra.mxu0 %v540_v16  ;;  %567 = vmatprep.subr.bf16.mxu1 %v566_v24  ;;  %v600_v11 = vpack.c.bf16 %v256_v10, %v254_v9  ;;  %v602_v14 = vpack.c.bf16 %v261_v13, %v259_v12  ;;  %v258_v15 = vld [vmem:[#allocation7 + $0x1e0] sm:$0xff]  ;;  %v260_v16 = vld [vmem:[#allocation7 + $0x1f0] sm:$0xff]  ;;  %v364_v19 = vld [vmem:[#allocation8 + $0x88] sm:$0xff]  ;;  %v121_v61 = vsub.s32 1, %v116_v58 }
  0x6b   :  { %v604_v17 = vpack.c.bf16 %v260_v16, %v258_v15  ;;  %v363_v18 = vld [vmem:[#allocation8 + $0x80] sm:$0xff]  ;;  %v348_v22 = vld [vmem:[#allocation8 + $0x8] sm:$0xff]  ;;  %v366_v24 = vld [vmem:[#allocation8 + $0x98] sm:$0xff] }
  0x6c   :  { %v347_v20 = vld [vmem:[#allocation8] sm:$0xff]  ;;  %v606_v21 = vpack.c.bf16 %v364_v19, %v363_v18  ;;  %v349_v27 = vld [vmem:[#allocation8 + $0x10] sm:$0xff]  ;;  %v350_v28 = vld [vmem:[#allocation8 + $0x18] sm:$0xff] }
  0x6d   :  { %190 = vmatmul.mubr.f32.vlgmr.msra.gmra.mrb[0].mxu0 %v80_v23  ;;  %569 = vmatpush1.bf16.msra.mxu1 %v568_v29  ;;  %v365_v23 = vld [vmem:[#allocation8 + $0x90] sm:$0xff]  ;;  %v608_v25 = vpack.c.bf16 %v348_v22, %v347_v20  ;;  %v367_v29 = vld [vmem:[#allocation8 + $0xa0] sm:$0xff]  ;;  %v612_v31 = vpack.c.bf16 %v350_v28, %v349_v27  ;;  %v352_v34 = vld [vmem:[#allocation8 + $0x28] sm:$0xff] }
  0x6e   :  { %571 = vmatprep.subr.bf16.mxu1 %v570_v30  ;;  %v610_v26 = vpack.c.bf16 %v366_v24, %v365_v23  ;;  %607 = vmatprep.subr.bf16.mxu0 %v606_v21  ;;  %v368_v30 = vld [vmem:[#allocation8 + $0xa8] sm:$0xff]  ;;  %v351_v33 = vld [vmem:[#allocation8 + $0x20] sm:$0xff]  ;;  %v353_v39 = vld [vmem:[#allocation8 + $0x30] sm:$0xff] }
  0x6f   :  { %609 = vmatpush3.bf16.msra.mxu0 %v608_v25  ;;  %v614_v32 = vpack.c.bf16 %v368_v30, %v367_v29  ;;  %v616_v37 = vpack.c.bf16 %v352_v34, %v351_v33  ;;  %v354_v40 = vld [vmem:[#allocation8 + $0x38] sm:$0xff]  ;;  %v355_v45 = vld [vmem:[#allocation8 + $0x40] sm:$0xff]  ;;  %v356_v46 = vld [vmem:[#allocation8 + $0x48] sm:$0xff] }
  0x70   :  { %611 = vmatprep.subr.bf16.mxu0 %v610_v26  ;;  %v620_v43 = vpack.c.bf16 %v354_v40, %v353_v39  ;;  %v624_v49 = vpack.c.bf16 %v356_v46, %v355_v45  ;;  %v357_v51 = vld [vmem:[#allocation8 + $0x50] sm:$0xff]  ;;  %v358_v52 = vld [vmem:[#allocation8 + $0x58] sm:$0xff]  ;;  %v359_v6 = vld [vmem:[#allocation8 + $0x60] sm:$0xff] }
  0x71   :  { %573 = vmatpush1.bf16.msra.mxu1 %v572_v35  ;;  %v369_v35 = vld [vmem:[#allocation8 + $0xb0] sm:$0xff]  ;;  %v628_v55 = vpack.c.bf16 %v358_v52, %v357_v51  ;;  %v378_v10 = vld [vmem:[#allocation8 + $0xf8] sm:$0xff] }
  0x72   :  { %575 = vmatprep.subr.bf16.mxu1 %v574_v36  ;;  %v370_v36 = vld [vmem:[#allocation8 + $0xb8] sm:$0xff]  ;;  %v377_v9 = vld [vmem:[#allocation8 + $0xf0] sm:$0xff] }
  0x73   :  { %613 = vmatpush3.bf16.msra.mxu0 %v612_v31  ;;  %v618_v38 = vpack.c.bf16 %v370_v36, %v369_v35  ;;  %v361_v12 = vld [vmem:[#allocation8 + $0x70] sm:$0xff]  ;;  %v362_v13 = vld [vmem:[#allocation8 + $0x78] sm:$0xff] }
  0x74   :  { %615 = vmatprep.subr.bf16.mxu0 %v614_v32  ;;  %v262_v15 = vld [vmem:[%s895_s4] sm:$0x3]  ;;  %s736_s4 = scalar_lea.vmem %s464_s8, 128 }
  0x75   :  { %577 = vmatpush1.bf16.msra.mxu1 %v576_v41  ;;  %v371_v41 = vld [vmem:[#allocation8 + $0xc0] sm:$0xff]  ;;  %v474_v25 = vld [vmem:[%s897_s6] ss:$0 sm:$0xff]  ;;  %p737_p4 = scmp.ne.s32.totalorder %s464_s8, %s736_s4  ;;  %p742_p6 = scmp.lt.s32.totalorder %s736_s4, %s736_s4 }
  0x76   :  { %579 = vmatprep.subr.bf16.mxu1 %v578_v42  ;;  %v372_v42 = vld [vmem:[#allocation8 + $0xc8] sm:$0xff] }
  0x77   :  { %617 = vmatpush3.bf16.msra.mxu0 %v616_v37  ;;  %v622_v44 = vpack.c.bf16 %v372_v42, %v371_v41  ;;  %p743_p7 = por %p742_p6, %p741_p5 }
  0x78   :  { %619 = vmatprep.subr.bf16.mxu0 %v618_v38 }
  0x79   :  { %581 = vmatpush1.bf16.msra.mxu1 %v580_v47  ;;  %v373_v47 = vld [vmem:[#allocation8 + $0xd0] sm:$0xff]  ;;  %p744_p8 = pnand %p743_p7, %p737_p4 }
  0x7a   :  { %583 = vmatprep.subr.bf16.mxu1 %v582_v48  ;;  %v374_v48 = vld [vmem:[#allocation8 + $0xd8] sm:$0xff] }
  0x7b   :  { %621 = vmatpush3.bf16.msra.mxu0 %v620_v43  ;;  %v626_v50 = vpack.c.bf16 %v374_v48, %v373_v47 }
  0x7c   :  { %623 = vmatprep.subr.bf16.mxu0 %v622_v44 }
  0x7d   :  { %585 = vmatpush1.bf16.msra.mxu1 %v584_v53  ;;  %v375_v53 = vld [vmem:[#allocation8 + $0xe0] sm:$0xff] }
  0x7e   :  { %587 = vmatprep.subr.bf16.mxu1 %v586_v54  ;;  %v376_v54 = vld [vmem:[#allocation8 + $0xe8] sm:$0xff] }
  0x7f   :  { %625 = vmatpush3.bf16.msra.mxu0 %v624_v49  ;;  %v630_v56 = vpack.c.bf16 %v376_v54, %v375_v53 }
  0x80   :  { %627 = vmatprep.subr.bf16.mxu0 %v626_v50 }
  0x81   :  { %589 = vmatpush1.bf16.msra.mxu1 %v588_v59  ;;  %v117_v59 = vsub.s32 0, %v116_v58 }
  0x82   :  { %591 = vmatprep.subr.bf16.mxu1 %v590_v60  ;;  %v113_v60 = vld [vmem:[%s893_s2] sm:$0x3] }
  0x83   :  { %629 = vmatpush3.bf16.msra.mxu0 %v628_v55  ;;  %v118_v62 = vrot.slane %v113_v60, %v117_v59  ;;  %v122_v63 = vrot.slane %v113_v60, %v121_v61  ;;  %v267_v16 = vrot.slane %v262_v15, %v117_v59 }
  0x84   :  { %631 = vmatprep.subr.bf16.mxu0 %v630_v56 }
  0x85   :  { %593 = vmatpush1.bf16.msra.mxu1 %v592_v1 }
  0x86   :  { %595 = vmatprep.subr.bf16.mxu1 %v594_v2 }
  0x89   :  { %597 = vmatpush1.bf16.msra.mxu1 %v596_v7  ;;  %v360_v7 = vld [vmem:[#allocation8 + $0x68] sm:$0xff] }
  0x8a   :  { %599 = vmatprep.subr.bf16.mxu1 %v598_v8  ;;  %v632_v8 = vpack.c.bf16 %v360_v7, %v359_v6 }
  0x8c   :  { %633 = vmatpush3.bf16.msra.mxu0 %v632_v8 }
  0x8d   :  { %601 = vmatpush1.bf16.msra.mxu1 %v600_v11  ;;  %v634_v11 = vpack.c.bf16 %v378_v10, %v377_v9 }
  0x8e   :  { %603 = vmatprep.subr.bf16.mxu1 %v602_v14  ;;  %v636_v14 = vpack.c.bf16 %v362_v13, %v361_v12 }
  0x8f   :  { %635 = vmatprep.subr.bf16.mxu0 %v634_v11 }
  0x90   :  { %637 = vmatpush3.bf16.msra.mxu0 %v636_v14 }
  0x91   :  { %605 = vmatpush1.bf16.msra.mxu1 %v604_v17  ;;  %v271_v17 = vrot.slane %v262_v15, %v121_v61 }
 0x140   :  { %v191_v0 = vpop.f32.mrb[0].mxu0 }
 0x141   :  { %v192_v1 = vadd.f32 %v191_v0, %v118_v62  ;;  %v193_v2 = vpop.f32.mrb[1].mxu0 }
 0x142   :  { %v194_v3 = vadd.f32 %v193_v2, %v122_v63 }
 0x143   :  { %v196_v5 = vmax.f32 %v192_v1, 0.0 }
 0x144   :  { %v197_v4 = vmax.f32 %v194_v3, 0.0 }
 0x146   :  { %338 = vmatprep.mubr.f32.mxu1 %v197_v4 }
 0x147   :  { %339 = vmatmul.mubr.f32.vlgmr.msra.gmra.mrb[0].mxu1 %v196_v5 }
 0x21a   :  { %v340_v18 = vpop.f32.mrb[0].mxu1 }
 0x21b   :  { %v341_v19 = vadd.f32 %v340_v18, %v267_v16  ;;  %v342_v20 = vpop.f32.mrb[1].mxu1 }
 0x21c   :  { %v343_v21 = vadd.f32 %v342_v20, %v271_v17 }
 0x21d   :  { %v345_v23 = vmax.f32 %v341_v19, 0.0 }
 0x21e   :  { %v346_v22 = vmax.f32 %v343_v21, 0.0 }
 0x220   :  { %450 = vmatprep.mubr.f32.mxu0 %v346_v22 }
 0x221   :  { %451 = vmatmul.mubr.f32.vlgmr.msra.gmra.mrb[2].mxu0 %v345_v23 }
 0x2f4   :  { %v507_v24 = vpop.f32.mrb[2].mxu0 }
 0x2f5   :  { %v508_v26 = vpop.f32.mrb[3].mxu0 }
 0x2f6   :  { %v509_v27 = vadd.f32 %v508_v26, %v507_v24 }
 0x2f8   :  { %v453_v28 = vadd.f32 %v509_v27, %v474_v25 }
 0x2fa   :  { %456 = vst [vmem:[#allocation10] sm:$0xff] %v453_v28 }
 0x2fb   :  { %747 = shalt.err (!%p744_p8)
}
 0x2fc   :  { %s748_s13 = scalar_lea.hbm %s898_s7, 128 }
 0x2fd   :  { %p749_p9 = scmp.ne.s32.totalorder %s898_s7, %s748_s13  ;;  %p752_p10 = scmp.lt.u32.totalorder %s748_s13, %s898_s7 }
 0x2ff   :  { %p754_p11 = pnand %p752_p10, %p749_p9 }
 0x301   :  { %757 = shalt.err (!%p754_p11)
}
 0x302   :  { %466 = dma.vmem_to_hbm [thread:$0]  %s464_s8, 128, %s898_s7, [#allocation4]  }
 0x303   :  { %764 = dma.done.wait [#allocation4], 128  }
 0x304   :  { %765 = vsyncadd [#allocation4], 4294967168 }
 0x305   :  { %470 = vsyncpa [#allocation3], 1 }
 0x306   :  { %471 = vsyncpa [#allocation6], 1 }
 0x307   :  { %472 = vsyncpa [#allocation9], 1 }
 0x308   :  { %473 = vsyncpa [#allocation4], 1 }

</bundles_post_ra>
